<compile_context>
chip_gen: v7x
topology: tpu7x:2x2x1
jax: 0.10.0
libtpu: 0.0.40
codegen_flags: <defaults>
</compile_context>

<pallas_src>
import jax
import jax.numpy as jnp
from jax import lax
from jax.experimental import pallas as pl
from jax.experimental.pallas import tpu as pltpu

BN_EPS = 1e-5       # PyTorch BatchNorm1d default eps
LANE = 128          # TPU lane width -> pad all feature dims to this


def _edge_classifier_kernel(
    x_ref,
    w1_ref, b1_ref, g1_ref, be1_ref, m1_ref, v1_ref,
    w2_ref, b2_ref, g2_ref, be2_ref, m2_ref, v2_ref,
    w3_ref, b3_ref,
    o_ref,
):
    """Fused fc1->bn1->relu->fc2->bn2->relu->fc3->sigmoid for one row block."""
    x = x_ref[...]                                             # (TM, 128)

    # fc1 + BatchNorm1d (eval: running stats) + ReLU
    h = jnp.dot(x, w1_ref[...], preferred_element_type=jnp.float32) + b1_ref[...]
    s1 = g1_ref[...] * lax.rsqrt(v1_ref[...] + BN_EPS)         # EUP rsqrt
    h = jnp.maximum((h - m1_ref[...]) * s1 + be1_ref[...], 0.0)
    # TODO(synk): nn.Dropout is the identity in eval mode (training=False); omitted.

    # fc2 + BatchNorm1d + ReLU
    h = jnp.dot(h, w2_ref[...], preferred_element_type=jnp.float32) + b2_ref[...]
    s2 = g2_ref[...] * lax.rsqrt(v2_ref[...] + BN_EPS)
    h = jnp.maximum((h - m2_ref[...]) * s2 + be2_ref[...], 0.0)

    # fc3 + sigmoid
    z = jnp.dot(h, w3_ref[...], preferred_element_type=jnp.float32) + b3_ref[...]
    o_ref[...] = 1.0 / (1.0 + jnp.exp(-z))                     # exp on EUP


# ----------------------------- host-side helpers -----------------------------

def _round_up(x, m):
    return (x + m - 1) // m * m


def _pad_mat(w, rows, cols):
    out = jnp.zeros((rows, cols), jnp.float32)
    return out.at[: w.shape[0], : w.shape[1]].set(w.astype(jnp.float32))


def _pad_row(v, cols, fill=0.0):
    out = jnp.full((1, cols), fill, jnp.float32)
    return out.at[0, : v.shape[0]].set(v.astype(jnp.float32))


def prepare_params(p):
    """One-time padding of all weights / BN params to lane-dense f32 blocks."""
    return (
        _pad_mat(p["w1"], LANE, LANE), _pad_row(p["b1"], LANE),
        _pad_row(p["bn1_gamma"], LANE), _pad_row(p["bn1_beta"], LANE),
        _pad_row(p["bn1_mean"], LANE), _pad_row(p["bn1_var"], LANE, fill=1.0),
        _pad_mat(p["w2"], LANE, LANE), _pad_row(p["b2"], LANE),
        _pad_row(p["bn2_gamma"], LANE), _pad_row(p["bn2_beta"], LANE),
        _pad_row(p["bn2_mean"], LANE), _pad_row(p["bn2_var"], LANE, fill=1.0),
        _pad_mat(p["w3"], LANE, LANE), _pad_row(p["b3"], LANE),
    )


def _vmem_limit_bytes():
    """Generation-aware VMEM cap with headroom (v7x: 64 MiB physical)."""
    try:
        cap = pltpu.get_tpu_info().vmem_capacity_bytes
    except Exception:
        cap = 64 << 20
    return int(cap * 3 // 4)


def edge_classifier_forward(x, padded_params, *, output_dim=1, block_rows=256):
    """x: (N, input_dim) edge embeddings -> (N, output_dim) sigmoid scores."""
    n, f = x.shape
    n8 = _round_up(max(n, 8), 8)
    tm = min(block_rows, n8)            # row tile (multiple of 8)
    n_pad = _round_up(n8, tm)

    x_pad = jnp.zeros((n_pad, LANE), jnp.float32)
    x_pad = x_pad.at[:n, :f].set(x.astype(jnp.float32))

    row_spec = pl.BlockSpec((tm, LANE), lambda i: (i, 0))
    full_spec = lambda shape: pl.BlockSpec(shape, lambda i: (0, 0))

    out = pl.pallas_call(
        _edge_classifier_kernel,
        out_shape=jax.ShapeDtypeStruct((n_pad, LANE), jnp.float32),
        grid=(n_pad // tm,),
        in_specs=[row_spec] + [full_spec(p.shape) for p in padded_params],
        out_specs=row_spec,
        compiler_params=pltpu.CompilerParams(
            dimension_semantics=("parallel",),      # shard rows across TCs (v7x)
            vmem_limit_bytes=_vmem_limit_bytes(),
        ),
    )(x_pad, *padded_params)

    return out[:n, :output_dim]


# ------------------------------- reference & demo -----------------------------

def init_params(key, input_dim=14, hidden_dim1=32, hidden_dim2=16, output_dim=1):
    ks = jax.random.split(key, 14)

    def lin(kw, kb, fin, fout):
        bound = 1.0 / jnp.sqrt(jnp.float32(fin))
        w = jax.random.uniform(kw, (fin, fout), jnp.float32, -bound, bound)
        b = jax.random.uniform(kb, (fout,), jnp.float32, -bound, bound)
        return w, b

    w1, b1 = lin(ks[0], ks[1], input_dim, hidden_dim1)
    w2, b2 = lin(ks[2], ks[3], hidden_dim1, hidden_dim2)
    w3, b3 = lin(ks[4], ks[5], hidden_dim2, output_dim)
    return {
        "w1": w1, "b1": b1, "w2": w2, "b2": b2, "w3": w3, "b3": b3,
        # "trained" BatchNorm parameters / running stats (non-trivial BN)
        "bn1_gamma": 1.0 + 0.1 * jax.random.normal(ks[6], (hidden_dim1,)),
        "bn1_beta": 0.1 * jax.random.normal(ks[7], (hidden_dim1,)),
        "bn1_mean": 0.1 * jax.random.normal(ks[8], (hidden_dim1,)),
        "bn1_var": jnp.abs(1.0 + 0.1 * jax.random.normal(ks[9], (hidden_dim1,))),
        "bn2_gamma": 1.0 + 0.1 * jax.random.normal(ks[10], (hidden_dim2,)),
        "bn2_beta": 0.1 * jax.random.normal(ks[11], (hidden_dim2,)),
        "bn2_mean": 0.1 * jax.random.normal(ks[12], (hidden_dim2,)),
        "bn2_var": jnp.abs(1.0 + 0.1 * jax.random.normal(ks[13], (hidden_dim2,))),
    }


def reference_forward(x, p):
    h = x @ p["w1"] + p["b1"]
    h = (h - p["bn1_mean"]) / jnp.sqrt(p["bn1_var"] + BN_EPS) * p["bn1_gamma"] + p["bn1_beta"]
    h = jnp.maximum(h, 0.0)
    h = h @ p["w2"] + p["b2"]
    h = (h - p["bn2_mean"]) / jnp.sqrt(p["bn2_var"] + BN_EPS) * p["bn2_gamma"] + p["bn2_beta"]
    h = jnp.maximum(h, 0.0)
    z = h @ p["w3"] + p["b3"]
    return 1.0 / (1.0 + jnp.exp(-z))


if __name__ == "__main__":
    N, IN_DIM, H1, H2, OUT_DIM = 64, 14, 32, 16, 1

    key = jax.random.PRNGKey(0)
    kx, kp = jax.random.split(key)

    x = jax.random.normal(kx, (N, IN_DIM), dtype=jnp.float32)
    raw_params = init_params(kp, IN_DIM, H1, H2, OUT_DIM)
    padded_params = prepare_params(raw_params)

    out = edge_classifier_forward(x, padded_params, output_dim=OUT_DIM)
    out = jax.block_until_ready(out)

    assert out.shape == (N, OUT_DIM), out.shape
    ref = reference_forward(x, raw_params)
    max_err = float(jnp.max(jnp.abs(out - ref)))
    assert jnp.allclose(out, ref, atol=1e-4, rtol=1e-4), max_err
    assert bool(jnp.all((out >= 0.0) & (out <= 1.0)))

    print("KERNEL_OK")
</pallas_src>

<mosaic_0001>
module attributes {stable_mosaic.version = 11 : i64} {
  func.func @_edge_classifier_kernel(%arg0: i32, %arg1: memref<64x128xf32, #tpu.memory_space<vmem>>, %arg2: memref<128x128xf32, #tpu.memory_space<vmem>>, %arg3: memref<1x128xf32, #tpu.memory_space<vmem>>, %arg4: memref<1x128xf32, #tpu.memory_space<vmem>>, %arg5: memref<1x128xf32, #tpu.memory_space<vmem>>, %arg6: memref<1x128xf32, #tpu.memory_space<vmem>>, %arg7: memref<1x128xf32, #tpu.memory_space<vmem>>, %arg8: memref<128x128xf32, #tpu.memory_space<vmem>>, %arg9: memref<1x128xf32, #tpu.memory_space<vmem>>, %arg10: memref<1x128xf32, #tpu.memory_space<vmem>>, %arg11: memref<1x128xf32, #tpu.memory_space<vmem>>, %arg12: memref<1x128xf32, #tpu.memory_space<vmem>>, %arg13: memref<1x128xf32, #tpu.memory_space<vmem>>, %arg14: memref<128x128xf32, #tpu.memory_space<vmem>>, %arg15: memref<1x128xf32, #tpu.memory_space<vmem>>, %arg16: memref<64x128xf32, #tpu.memory_space<vmem>>) attributes {dimension_semantics = [#tpu.dimension_semantics<parallel>], iteration_bounds = array<i64: 1>, scalar_prefetch = 0 : i64, scratch_operands = 0 : i64, tpu.core_type = #tpu.core_type<tc>, window_params = [{transform_indices = @transform_0, window_bounds = array<i64: 64, 128>}, {pipeline_mode = #tpu.pipeline_mode<synchronous>, transform_indices = @transform_1, window_bounds = array<i64: 128, 128>}, {pipeline_mode = #tpu.pipeline_mode<synchronous>, transform_indices = @transform_2, window_bounds = array<i64: 1, 128>}, {pipeline_mode = #tpu.pipeline_mode<synchronous>, transform_indices = @transform_3, window_bounds = array<i64: 1, 128>}, {pipeline_mode = #tpu.pipeline_mode<synchronous>, transform_indices = @transform_4, window_bounds = array<i64: 1, 128>}, {pipeline_mode = #tpu.pipeline_mode<synchronous>, transform_indices = @transform_5, window_bounds = array<i64: 1, 128>}, {pipeline_mode = #tpu.pipeline_mode<synchronous>, transform_indices = @transform_6, window_bounds = array<i64: 1, 128>}, {pipeline_mode = #tpu.pipeline_mode<synchronous>, transform_indices = @transform_7, window_bounds = array<i64: 128, 128>}, {pipeline_mode = #tpu.pipeline_mode<synchronous>, transform_indices = @transform_8, window_bounds = array<i64: 1, 128>}, {pipeline_mode = #tpu.pipeline_mode<synchronous>, transform_indices = @transform_9, window_bounds = array<i64: 1, 128>}, {pipeline_mode = #tpu.pipeline_mode<synchronous>, transform_indices = @transform_10, window_bounds = array<i64: 1, 128>}, {pipeline_mode = #tpu.pipeline_mode<synchronous>, transform_indices = @transform_11, window_bounds = array<i64: 1, 128>}, {pipeline_mode = #tpu.pipeline_mode<synchronous>, transform_indices = @transform_12, window_bounds = array<i64: 1, 128>}, {pipeline_mode = #tpu.pipeline_mode<synchronous>, transform_indices = @transform_13, window_bounds = array<i64: 128, 128>}, {pipeline_mode = #tpu.pipeline_mode<synchronous>, transform_indices = @transform_14, window_bounds = array<i64: 1, 128>}, {transform_indices = @transform_15, window_bounds = array<i64: 64, 128>}]} {
    %c0 = arith.constant 0 : index
    %c0_0 = arith.constant 0 : index
    %0 = vector.load %arg1[%c0, %c0_0] : memref<64x128xf32, #tpu.memory_space<vmem>>, vector<64x128xf32>
    %c0_1 = arith.constant 0 : index
    %c0_2 = arith.constant 0 : index
    %1 = vector.load %arg2[%c0_1, %c0_2] : memref<128x128xf32, #tpu.memory_space<vmem>>, vector<128x128xf32>
    %cst = arith.constant dense<0.000000e+00> : vector<64x128xf32>
    %2 = tpu.matmul %0, %1, %cst {dimension_numbers = #tpu.dot_dimension_numbers<[1], [0], [0], [1], [0, 0, 1, 1], [], []>} : vector<64x128xf32>, vector<128x128xf32>, vector<64x128xf32> -> vector<64x128xf32>
    %c0_3 = arith.constant 0 : index
    %c0_4 = arith.constant 0 : index
    %3 = vector.load %arg3[%c0_3, %c0_4] : memref<1x128xf32, #tpu.memory_space<vmem>>, vector<1x128xf32>
    %4 = vector.broadcast %3 : vector<1x128xf32> to vector<64x128xf32>
    %5 = arith.addf %2, %4 : vector<64x128xf32>
    %c0_5 = arith.constant 0 : index
    %c0_6 = arith.constant 0 : index
    %6 = vector.load %arg4[%c0_5, %c0_6] : memref<1x128xf32, #tpu.memory_space<vmem>>, vector<1x128xf32>
    %c0_7 = arith.constant 0 : index
    %c0_8 = arith.constant 0 : index
    %7 = vector.load %arg7[%c0_7, %c0_8] : memref<1x128xf32, #tpu.memory_space<vmem>>, vector<1x128xf32>
    %cst_9 = arith.constant 9.99999974E-6 : f32
    %8 = vector.broadcast %cst_9 : f32 to vector<1x128xf32>
    %9 = arith.addf %7, %8 : vector<1x128xf32>
    %10 = math.rsqrt %9 : vector<1x128xf32>
    %11 = arith.mulf %6, %10 : vector<1x128xf32>
    %c0_10 = arith.constant 0 : index
    %c0_11 = arith.constant 0 : index
    %12 = vector.load %arg6[%c0_10, %c0_11] : memref<1x128xf32, #tpu.memory_space<vmem>>, vector<1x128xf32>
    %13 = vector.broadcast %12 : vector<1x128xf32> to vector<64x128xf32>
    %14 = arith.subf %5, %13 : vector<64x128xf32>
    %15 = vector.broadcast %11 : vector<1x128xf32> to vector<64x128xf32>
    %16 = arith.mulf %14, %15 : vector<64x128xf32>
    %c0_12 = arith.constant 0 : index
    %c0_13 = arith.constant 0 : index
    %17 = vector.load %arg5[%c0_12, %c0_13] : memref<1x128xf32, #tpu.memory_space<vmem>>, vector<1x128xf32>
    %18 = vector.broadcast %17 : vector<1x128xf32> to vector<64x128xf32>
    %19 = arith.addf %16, %18 : vector<64x128xf32>
    %cst_14 = arith.constant 0.000000e+00 : f32
    %20 = vector.broadcast %cst_14 : f32 to vector<64x128xf32>
    %21 = arith.maximumf %19, %20 : vector<64x128xf32>
    %c0_15 = arith.constant 0 : index
    %c0_16 = arith.constant 0 : index
    %22 = vector.load %arg8[%c0_15, %c0_16] : memref<128x128xf32, #tpu.memory_space<vmem>>, vector<128x128xf32>
    %cst_17 = arith.constant dense<0.000000e+00> : vector<64x128xf32>
    %23 = tpu.matmul %21, %22, %cst_17 {dimension_numbers = #tpu.dot_dimension_numbers<[1], [0], [0], [1], [0, 0, 1, 1], [], []>} : vector<64x128xf32>, vector<128x128xf32>, vector<64x128xf32> -> vector<64x128xf32>
    %c0_18 = arith.constant 0 : index
    %c0_19 = arith.constant 0 : index
    %24 = vector.load %arg9[%c0_18, %c0_19] : memref<1x128xf32, #tpu.memory_space<vmem>>, vector<1x128xf32>
    %25 = vector.broadcast %24 : vector<1x128xf32> to vector<64x128xf32>
    %26 = arith.addf %23, %25 : vector<64x128xf32>
    %c0_20 = arith.constant 0 : index
    %c0_21 = arith.constant 0 : index
    %27 = vector.load %arg10[%c0_20, %c0_21] : memref<1x128xf32, #tpu.memory_space<vmem>>, vector<1x128xf32>
    %c0_22 = arith.constant 0 : index
    %c0_23 = arith.constant 0 : index
    %28 = vector.load %arg13[%c0_22, %c0_23] : memref<1x128xf32, #tpu.memory_space<vmem>>, vector<1x128xf32>
    %cst_24 = arith.constant 9.99999974E-6 : f32
    %29 = vector.broadcast %cst_24 : f32 to vector<1x128xf32>
    %30 = arith.addf %28, %29 : vector<1x128xf32>
    %31 = math.rsqrt %30 : vector<1x128xf32>
    %32 = arith.mulf %27, %31 : vector<1x128xf32>
    %c0_25 = arith.constant 0 : index
    %c0_26 = arith.constant 0 : index
    %33 = vector.load %arg12[%c0_25, %c0_26] : memref<1x128xf32, #tpu.memory_space<vmem>>, vector<1x128xf32>
    %34 = vector.broadcast %33 : vector<1x128xf32> to vector<64x128xf32>
    %35 = arith.subf %26, %34 : vector<64x128xf32>
    %36 = vector.broadcast %32 : vector<1x128xf32> to vector<64x128xf32>
    %37 = arith.mulf %35, %36 : vector<64x128xf32>
    %c0_27 = arith.constant 0 : index
    %c0_28 = arith.constant 0 : index
    %38 = vector.load %arg11[%c0_27, %c0_28] : memref<1x128xf32, #tpu.memory_space<vmem>>, vector<1x128xf32>
    %39 = vector.broadcast %38 : vector<1x128xf32> to vector<64x128xf32>
    %40 = arith.addf %37, %39 : vector<64x128xf32>
    %cst_29 = arith.constant 0.000000e+00 : f32
    %41 = vector.broadcast %cst_29 : f32 to vector<64x128xf32>
    %42 = arith.maximumf %40, %41 : vector<64x128xf32>
    %c0_30 = arith.constant 0 : index
    %c0_31 = arith.constant 0 : index
    %43 = vector.load %arg14[%c0_30, %c0_31] : memref<128x128xf32, #tpu.memory_space<vmem>>, vector<128x128xf32>
    %cst_32 = arith.constant dense<0.000000e+00> : vector<64x128xf32>
    %44 = tpu.matmul %42, %43, %cst_32 {dimension_numbers = #tpu.dot_dimension_numbers<[1], [0], [0], [1], [0, 0, 1, 1], [], []>} : vector<64x128xf32>, vector<128x128xf32>, vector<64x128xf32> -> vector<64x128xf32>
    %c0_33 = arith.constant 0 : index
    %c0_34 = arith.constant 0 : index
    %45 = vector.load %arg15[%c0_33, %c0_34] : memref<1x128xf32, #tpu.memory_space<vmem>>, vector<1x128xf32>
    %46 = vector.broadcast %45 : vector<1x128xf32> to vector<64x128xf32>
    %47 = arith.addf %44, %46 : vector<64x128xf32>
    %cst_35 = arith.constant 0.000000e+00 : f32
    %48 = vector.broadcast %cst_35 : f32 to vector<64x128xf32>
    %49 = arith.subf %48, %47 : vector<64x128xf32>
    %50 = math.exp %49 : vector<64x128xf32>
    %cst_36 = arith.constant 1.000000e+00 : f32
    %51 = vector.broadcast %cst_36 : f32 to vector<64x128xf32>
    %52 = arith.addf %51, %50 : vector<64x128xf32>
    %cst_37 = arith.constant 1.000000e+00 : f32
    %53 = vector.broadcast %cst_37 : f32 to vector<64x128xf32>
    %54 = arith.divf %53, %52 : vector<64x128xf32>
    %c0_38 = arith.constant 0 : index
    %c0_39 = arith.constant 0 : index
    %55 = vector.load %arg16[%c0_38, %c0_39] : memref<64x128xf32, #tpu.memory_space<vmem>>, vector<64x128xf32>
    tpu.vector_store %arg16[%c0_38, %c0_39], %54 {strides = array<i32>} : memref<64x128xf32, #tpu.memory_space<vmem>>, vector<64x128xf32>,
    return
  }
  func.func @transform_0(%arg0: i32) -> (i32, i32) {
    %c0_i32 = arith.constant 0 : i32
    %c0_i32_0 = arith.constant 0 : i32
    return %arg0, %c0_i32 : i32, i32
  }
  func.func @transform_1(%arg0: i32) -> (i32, i32) {
    %c0_i32 = arith.constant 0 : i32
    %c0_i32_0 = arith.constant 0 : i32
    %c0_i32_1 = arith.constant 0 : i32
    return %c0_i32, %c0_i32_0 : i32, i32
  }
  func.func @transform_2(%arg0: i32) -> (i32, i32) {
    %c0_i32 = arith.constant 0 : i32
    %c0_i32_0 = arith.constant 0 : i32
    %c0_i32_1 = arith.constant 0 : i32
    return %c0_i32, %c0_i32_0 : i32, i32
  }
  func.func @transform_3(%arg0: i32) -> (i32, i32) {
    %c0_i32 = arith.constant 0 : i32
    %c0_i32_0 = arith.constant 0 : i32
    %c0_i32_1 = arith.constant 0 : i32
    return %c0_i32, %c0_i32_0 : i32, i32
  }
  func.func @transform_4(%arg0: i32) -> (i32, i32) {
    %c0_i32 = arith.constant 0 : i32
    %c0_i32_0 = arith.constant 0 : i32
    %c0_i32_1 = arith.constant 0 : i32
    return %c0_i32, %c0_i32_0 : i32, i32
  }
  func.func @transform_5(%arg0: i32) -> (i32, i32) {
    %c0_i32 = arith.constant 0 : i32
    %c0_i32_0 = arith.constant 0 : i32
    %c0_i32_1 = arith.constant 0 : i32
    return %c0_i32, %c0_i32_0 : i32, i32
  }
  func.func @transform_6(%arg0: i32) -> (i32, i32) {
    %c0_i32 = arith.constant 0 : i32
    %c0_i32_0 = arith.constant 0 : i32
    %c0_i32_1 = arith.constant 0 : i32
    return %c0_i32, %c0_i32_0 : i32, i32
  }
  func.func @transform_7(%arg0: i32) -> (i32, i32) {
    %c0_i32 = arith.constant 0 : i32
    %c0_i32_0 = arith.constant 0 : i32
    %c0_i32_1 = arith.constant 0 : i32
    return %c0_i32, %c0_i32_0 : i32, i32
  }
  func.func @transform_8(%arg0: i32) -> (i32, i32) {
    %c0_i32 = arith.constant 0 : i32
    %c0_i32_0 = arith.constant 0 : i32
    %c0_i32_1 = arith.constant 0 : i32
    return %c0_i32, %c0_i32_0 : i32, i32
  }
  func.func @transform_9(%arg0: i32) -> (i32, i32) {
    %c0_i32 = arith.constant 0 : i32
    %c0_i32_0 = arith.constant 0 : i32
    %c0_i32_1 = arith.constant 0 : i32
    return %c0_i32, %c0_i32_0 : i32, i32
  }
  func.func @transform_10(%arg0: i32) -> (i32, i32) {
    %c0_i32 = arith.constant 0 : i32
    %c0_i32_0 = arith.constant 0 : i32
    %c0_i32_1 = arith.constant 0 : i32
    return %c0_i32, %c0_i32_0 : i32, i32
  }
  func.func @transform_11(%arg0: i32) -> (i32, i32) {
    %c0_i32 = arith.constant 0 : i32
    %c0_i32_0 = arith.constant 0 : i32
    %c0_i32_1 = arith.constant 0 : i32
    return %c0_i32, %c0_i32_0 : i32, i32
  }
  func.func @transform_12(%arg0: i32) -> (i32, i32) {
    %c0_i32 = arith.constant 0 : i32
    %c0_i32_0 = arith.constant 0 : i32
    %c0_i32_1 = arith.constant 0 : i32
    return %c0_i32, %c0_i32_0 : i32, i32
  }
  func.func @transform_13(%arg0: i32) -> (i32, i32) {
    %c0_i32 = arith.constant 0 : i32
    %c0_i32_0 = arith.constant 0 : i32
    %c0_i32_1 = arith.constant 0 : i32
    return %c0_i32, %c0_i32_0 : i32, i32
  }
  func.func @transform_14(%arg0: i32) -> (i32, i32) {
    %c0_i32 = arith.constant 0 : i32
    %c0_i32_0 = arith.constant 0 : i32
    %c0_i32_1 = arith.constant 0 : i32
    return %c0_i32, %c0_i32_0 : i32, i32
  }
  func.func @transform_15(%arg0: i32) -> (i32, i32) {
    %c0_i32 = arith.constant 0 : i32
    %c0_i32_0 = arith.constant 0 : i32
    return %arg0, %c0_i32 : i32, i32
  }
}

</mosaic_0001>

<bundles_post_ra>
// kernel: tpu_custom_call.1
= control target key start
LH: loop header
LB: loop body
LE: loop exit
PB: predicated region body
PF: predicated region fallthrough
CT: control target
= control target key end

     0   :  { %20 = vsyncpa [#allocation3], 0  ;;  %s1417_s0 = inlined_call_operand.hbm [shape: f32[64,128], index: 0, kind: input, shape index: {}]   ;;  %s1418_s1 = inlined_call_operand.hbm [shape: f32[128,128], index: 1, kind: input, shape index: {}]   ;;  %s1419_s2 = inlined_call_operand.vmem [shape: f32[1,128], index: 2, kind: input, shape index: {}]   ;;  %s1420_s3 = inlined_call_operand.vmem [shape: f32[1,128], index: 3, kind: input, shape index: {}]   ;;  %s1421_s4 = inlined_call_operand.vmem [shape: f32[1,128], index: 4, kind: input, shape index: {}]   ;;  %s1422_s5 = inlined_call_operand.vmem [shape: f32[1,128], index: 5, kind: input, shape index: {}]   ;;  %s1423_s6 = inlined_call_operand.vmem [shape: f32[1,128], index: 6, kind: input, shape index: {}]   ;;  %s1424_s7 = inlined_call_operand.hbm [shape: f32[128,128], index: 7, kind: input, shape index: {}]   ;;  %s1425_s8 = inlined_call_operand.vmem [shape: f32[1,128], index: 8, kind: input, shape index: {}]   ;;  %s1426_s9 = inlined_call_operand.vmem [shape: f32[1,128], index: 9, kind: input, shape index: {}]   ;;  %s1427_s10 = inlined_call_operand.vmem [shape: f32[1,128], index: 10, kind: input, shape index: {}]   ;;  %s1428_s11 = inlined_call_operand.vmem [shape: f32[1,128], index: 11, kind: input, shape index: {}]   ;;  %s1429_s12 = inlined_call_operand.vmem [shape: f32[1,128], index: 12, kind: input, shape index: {}]   ;;  %s1430_s13 = inlined_call_operand.hbm [shape: f32[128,128], index: 13, kind: input, shape index: {}]   ;;  %s1431_s14 = inlined_call_operand.vmem [shape: f32[1,128], index: 14, kind: input, shape index: {}]   ;;  %s1432_s15 = inlined_call_operand.hbm [shape: f32[64,128], index: 15, kind: output, shape index: {}]  }
   0x1   :  { %21 = vsyncpa [#allocation6], 0 }
   0x2   :  { %22 = vsyncpa [#allocation9], 0 }
   0x3   :  { %23 = vsyncpa [#allocation4], 0  ;;  %s1171_s18 = smov [#allocation5]   ;;  %s1172_s20 = smov [#allocation2]  }
   0x4   :  { %s41_s19 = sshll.u32 %s1171_s18, 4  ;;  %s29_s21 = sshll.u32 %s1172_s20, 4  ;;  %s42_s19 = int_to_ptr.vmem [resolvable:$true] %s41_s19  ;;  %s1258_s21 = int_to_ptr.vmem [resolvable:$true] %s29_s21 }
   0x5   :  { %s1053_s24 = scalar_lea.hbm %s1418_s1, 2048 }
   0x6   :  { %p1054_p0 = scmp.ne.s32.totalorder %s1418_s1, %s1053_s24  ;;  %p1057_p1 = scmp.lt.u32.totalorder %s1053_s24, %s1418_s1 }
   0x8   :  { %p1059_p2 = pnand %p1057_p1, %p1054_p0 }
   0xa   :  { %1062 = shalt.err (!%p1059_p2)
}
   0xb   :  { %s1063_s29 = scalar_lea.vmem %s42_s19, 2048  ;;  %p1068_p4 = scmp.lt.s32.totalorder %s42_s19, %s42_s19 }
   0xc   :  { %p1064_p3 = scmp.ne.s32.totalorder %s42_s19, %s1063_s29  ;;  %p1069_p5 = scmp.lt.s32.totalorder %s1063_s29, %s1063_s29 }
   0xe   :  { %p1070_p6 = por %p1069_p5, %p1068_p4 }
  0x10   :  { %p1071_p7 = pnand %p1070_p6, %p1064_p3 }
  0x12   :  { %1074 = shalt.err (!%p1071_p7)
}
  0x13   :  { %s1173_s30 = smov 128   ;;  %s1174_s16 = smov 8  }
  0x14   :  { %47 = dma.hbm_to_vmem [thread:$0]  %s1418_s1, 2048, %s42_s19, [#allocation6], %s1173_s30, %s1173_s30, %s1174_s16  }
  0x15   :  { %s1075_s23 = scalar_lea.hbm %s1417_s0, 1024 }
  0x16   :  { %p1076_p8 = scmp.ne.s32.totalorder %s1417_s0, %s1075_s23  ;;  %p1079_p9 = scmp.lt.u32.totalorder %s1075_s23, %s1417_s0 }
  0x18   :  { %p1081_p10 = pnand %p1079_p9, %p1076_p8 }
  0x1a   :  { %1084 = shalt.err (!%p1081_p10)
}
  0x1b   :  { %s1085_s28 = scalar_lea.vmem %s1258_s21, 1024  ;;  %p1090_p12 = scmp.lt.s32.totalorder %s1258_s21, %s1258_s21 }
  0x1c   :  { %p1086_p11 = scmp.ne.s32.totalorder %s1258_s21, %s1085_s28  ;;  %p1091_p13 = scmp.lt.s32.totalorder %s1085_s28, %s1085_s28 }
  0x1e   :  { %p1092_p0 = por %p1091_p13, %p1090_p12 }
  0x20   :  { %p1093_p1 = pnand %p1092_p0, %p1086_p11 }
  0x22   :  { %1096 = shalt.err (!%p1093_p1)
}
  0x23   :  { %35 = dma.hbm_to_vmem [thread:$0]  %s1417_s0, 1024, %s1258_s21, [#allocation3], %s1173_s30, %s1173_s30, %s1174_s16  }
  0x24   :  { %s1175_s29 = smov [#allocation7]   ;;  %s1176_s18 = smov [#allocation8]  }
  0x25   :  { %s63_s17 = sshll.u32 %s1175_s29, 4  ;;  %s85_s20 = sshll.u32 %s1176_s18, 4  ;;  %s64_s17 = int_to_ptr.vmem [resolvable:$true] %s63_s17  ;;  %s1295_s20 = int_to_ptr.vmem [resolvable:$true] %s85_s20 }
  0x26   :  { %s1097_s24 = scalar_lea.hbm %s1424_s7, 2048 }
  0x27   :  { %p1098_p2 = scmp.ne.s32.totalorder %s1424_s7, %s1097_s24  ;;  %p1101_p3 = scmp.lt.u32.totalorder %s1097_s24, %s1424_s7 }
  0x29   :  { %p1103_p4 = pnand %p1101_p3, %p1098_p2 }
  0x2b   :  { %1106 = shalt.err (!%p1103_p4)
}
  0x2c   :  { %s1107_s0 = scalar_lea.vmem %s64_s17, 2048  ;;  %p1112_p6 = scmp.lt.s32.totalorder %s64_s17, %s64_s17 }
  0x2d   :  { %p1108_p5 = scmp.ne.s32.totalorder %s64_s17, %s1107_s0  ;;  %p1113_p7 = scmp.lt.s32.totalorder %s1107_s0, %s1107_s0 }
  0x2f   :  { %p1114_p8 = por %p1113_p7, %p1112_p6 }
  0x31   :  { %p1115_p9 = pnand %p1114_p8, %p1108_p5 }
  0x33   :  { %1118 = shalt.err (!%p1115_p9)
}
  0x34   :  { %69 = dma.hbm_to_vmem [thread:$0]  %s1424_s7, 2048, %s64_s17, [#allocation6], %s1173_s30, %s1173_s30, %s1174_s16  }
  0x35   :  { %s1119_s18 = scalar_lea.hbm %s1430_s13, 2048 }
  0x36   :  { %p1120_p10 = scmp.ne.s32.totalorder %s1430_s13, %s1119_s18  ;;  %p1123_p11 = scmp.lt.u32.totalorder %s1119_s18, %s1430_s13 }
  0x38   :  { %p1125_p12 = pnand %p1123_p11, %p1120_p10 }
  0x3a   :  { %1128 = shalt.err (!%p1125_p12)
}
  0x3b   :  { %s1129_s26 = scalar_lea.vmem %s1295_s20, 2048  ;;  %p1134_p0 = scmp.lt.s32.totalorder %s1295_s20, %s1295_s20 }
  0x3c   :  { %p1130_p13 = scmp.ne.s32.totalorder %s1295_s20, %s1129_s26  ;;  %p1135_p1 = scmp.lt.s32.totalorder %s1129_s26, %s1129_s26 }
  0x3e   :  { %p1136_p2 = por %p1135_p1, %p1134_p0 }
  0x40   :  { %p1137_p3 = pnand %p1136_p2, %p1130_p13 }
  0x42   :  { %1140 = shalt.err (!%p1137_p3)
}
  0x43   :  { %91 = dma.hbm_to_vmem [thread:$0]  %s1430_s13, 2048, %s1295_s20, [#allocation9], %s1173_s30, %s1173_s30, %s1174_s16  }
  0x44   :  { %1163 = dma.done.wait [#allocation3], 1024  }
  0x45   :  { %1164 = vsyncadd [#allocation3], 4294966272 }
  0x46   :  { %1165 = dma.done.wait [#allocation6], 4096  }
  0x47   :  { %1166 = vsyncadd [#allocation6], 4294963200 }
  0x48   :  { %1167 = dma.done.wait [#allocation9], 2048  }
  0x49   :  { %1168 = vsyncadd [#allocation9], 4294965248  ;;  %v114_v0 = vld [vmem:[#allocation5] sm:$0xff]  ;;  %v115_v1 = vld [vmem:[#allocation5 + $0x8] sm:$0xff] }
  0x4a   :  { %v116_v2 = vld [vmem:[#allocation5 + $0x10] sm:$0xff]  ;;  %v898_v3 = vpack.c.bf16 %v115_v1, %v114_v0  ;;  %v117_v4 = vld [vmem:[#allocation5 + $0x18] sm:$0xff]  ;;  %v118_v6 = vld [vmem:[#allocation5 + $0x20] sm:$0xff] }
  0x4b   :  { %v902_v5 = vpack.c.bf16 %v117_v4, %v116_v2  ;;  %v119_v7 = vld [vmem:[#allocation5 + $0x28] sm:$0xff]  ;;  %v106_v9 = vld [vmem:[#allocation2] sm:$0xff]  ;;  %v120_v10 = vld [vmem:[#allocation5 + $0x30] sm:$0xff] }
  0x4c   :  { %899 = vmatprep.subr.bf16.mxu0 %v898_v3  ;;  %v906_v8 = vpack.c.bf16 %v119_v7, %v118_v6  ;;  %v121_v11 = vld [vmem:[#allocation5 + $0x38] sm:$0xff]  ;;  %798 = vmatprep.mubr.f32.mxu0 %v106_v9  ;;  %v299_v12 = vld [vmem:[#allocation7] sm:$0xff]  ;;  %v300_v13 = vld [vmem:[#allocation7 + $0x8] sm:$0xff]  ;;  %v263_v9 = vlaneseq }
  0x4d   :  { %901 = vmatpush3.bf16.msra.mxu0 %v898_v3  ;;  %v301_v14 = vld [vmem:[#allocation7 + $0x10] sm:$0xff]  ;;  %v910_v15 = vpack.c.bf16 %v121_v11, %v120_v10  ;;  %v122_v16 = vld [vmem:[#allocation5 + $0x40] sm:$0xff]  ;;  %v930_v17 = vpack.c.bf16 %v300_v13, %v299_v12  ;;  %v302_v18 = vld [vmem:[#allocation7 + $0x18] sm:$0xff] }
  0x4e   :  { %903 = vmatprep.subr.bf16.mxu0 %v902_v5  ;;  %v123_v19 = vld [vmem:[#allocation5 + $0x48] sm:$0xff]  ;;  %v934_v20 = vpack.c.bf16 %v302_v18, %v301_v14  ;;  %v303_v21 = vld [vmem:[#allocation7 + $0x20] sm:$0xff]  ;;  %v124_v24 = vld [vmem:[#allocation5 + $0x50] sm:$0xff]  ;;  %v1356_v10 = vshrl.u32 %v263_v9, 7 }
  0x4f   :  { %v304_v22 = vld [vmem:[#allocation7 + $0x28] sm:$0xff]  ;;  %931 = vmatprep.subr.bf16.mxu1 %v930_v17  ;;  %v914_v23 = vpack.c.bf16 %v123_v19, %v122_v16  ;;  %v125_v26 = vld [vmem:[#allocation5 + $0x58] sm:$0xff]  ;;  %v305_v27 = vld [vmem:[#allocation7 + $0x30] sm:$0xff] }
  0x50   :  { %933 = vmatpush3.bf16.msra.mxu1 %v930_v17  ;;  %v938_v25 = vpack.c.bf16 %v304_v22, %v303_v21  ;;  %v306_v28 = vld [vmem:[#allocation7 + $0x38] sm:$0xff]  ;;  %v918_v29 = vpack.c.bf16 %v125_v26, %v124_v24  ;;  %v126_v30 = vld [vmem:[#allocation5 + $0x60] sm:$0xff]  ;;  %v127_v32 = vld [vmem:[#allocation5 + $0x68] sm:$0xff]  ;;  %v265_v14 = vsub.s32 0, %v1356_v10 }
  0x51   :  { %905 = vmatpush3.bf16.msra.mxu0 %v902_v5  ;;  %935 = vmatprep.subr.bf16.mxu1 %v934_v20  ;;  %v942_v31 = vpack.c.bf16 %v306_v28, %v305_v27  ;;  %v307_v33 = vld [vmem:[#allocation7 + $0x40] sm:$0xff]  ;;  %v308_v34 = vld [vmem:[#allocation7 + $0x48] sm:$0xff]  ;;  %v922_v35 = vpack.c.bf16 %v127_v32, %v126_v30  ;;  %v128_v37 = vld [vmem:[#allocation5 + $0x70] sm:$0xff] }
  0x52   :  { %907 = vmatprep.subr.bf16.mxu0 %v906_v8  ;;  %v946_v36 = vpack.c.bf16 %v308_v34, %v307_v33  ;;  %v129_v38 = vld [vmem:[#allocation5 + $0x78] sm:$0xff]  ;;  %v107_v40 = vld [vmem:[#allocation2 + $0x8] sm:$0xff]  ;;  %v108_v41 = vld [vmem:[#allocation2 + $0x10] sm:$0xff] }
  0x53   :  { %v926_v39 = vpack.c.bf16 %v129_v38, %v128_v37  ;;  %v109_v42 = vld [vmem:[#allocation2 + $0x18] sm:$0xff]  ;;  %v110_v43 = vld [vmem:[#allocation2 + $0x20] sm:$0xff]  ;;  %v111_v44 = vld [vmem:[#allocation2 + $0x28] sm:$0xff] }
  0x54   :  { %937 = vmatpush3.bf16.msra.mxu1 %v934_v20  ;;  %v112_v45 = vld [vmem:[#allocation2 + $0x30] sm:$0xff]  ;;  %v113_v46 = vld [vmem:[#allocation2 + $0x38] sm:$0xff]  ;;  %v311_v50 = vld [vmem:[#allocation7 + $0x60] sm:$0xff] }
  0x55   :  { %909 = vmatpush3.bf16.msra.mxu0 %v906_v8  ;;  %939 = vmatprep.subr.bf16.mxu1 %v938_v25  ;;  %v309_v47 = vld [vmem:[#allocation7 + $0x50] sm:$0xff]  ;;  %v310_v48 = vld [vmem:[#allocation7 + $0x58] sm:$0xff]  ;;  %v312_v51 = vld [vmem:[#allocation7 + $0x68] sm:$0xff] }
  0x56   :  { %911 = vmatprep.subr.bf16.mxu0 %v910_v15  ;;  %v950_v49 = vpack.c.bf16 %v310_v48, %v309_v47  ;;  %v954_v52 = vpack.c.bf16 %v312_v51, %v311_v50  ;;  %v313_v53 = vld [vmem:[#allocation7 + $0x70] sm:$0xff]  ;;  %v314_v54 = vld [vmem:[#allocation7 + $0x78] sm:$0xff]  ;;  %v484_v56 = vld [vmem:[#allocation8] sm:$0xff] }
  0x57   :  { %v958_v55 = vpack.c.bf16 %v314_v54, %v313_v53  ;;  %v485_v57 = vld [vmem:[#allocation8 + $0x8] sm:$0xff]  ;;  %v486_v58 = vld [vmem:[#allocation8 + $0x10] sm:$0xff]  ;;  %v487_v60 = vld [vmem:[#allocation8 + $0x18] sm:$0xff] }
  0x58   :  { %941 = vmatpush3.bf16.msra.mxu1 %v938_v25  ;;  %v1332_v59 = vpack.c.bf16 %v485_v57, %v484_v56  ;;  %v1334_v61 = vpack.c.bf16 %v487_v60, %v486_v58  ;;  %v488_v62 = vld [vmem:[#allocation8 + $0x20] sm:$0xff]  ;;  %v489_v63 = vld [vmem:[#allocation8 + $0x28] sm:$0xff]  ;;  %v490_v1 = vld [vmem:[#allocation8 + $0x30] sm:$0xff] }
  0x59   :  { %913 = vmatpush3.bf16.msra.mxu0 %v910_v15  ;;  %943 = vmatprep.subr.bf16.mxu1 %v942_v31  ;;  %v1340_v0 = vpack.c.bf16 %v489_v63, %v488_v62  ;;  %v491_v2 = vld [vmem:[#allocation8 + $0x38] sm:$0xff]  ;;  %v492_v4 = vld [vmem:[#allocation8 + $0x40] sm:$0xff]  ;;  %v493_v5 = vld [vmem:[#allocation8 + $0x48] sm:$0xff] }
  0x5a   :  { %915 = vmatprep.subr.bf16.mxu0 %v914_v23  ;;  %v1344_v3 = vpack.c.bf16 %v491_v2, %v490_v1  ;;  %v1348_v6 = vpack.c.bf16 %v493_v5, %v492_v4  ;;  %v243_v7 = vld [vmem:[%s1423_s6] sm:$0x1] }
  0x5b   :  { %v244_v8 = vadd.f32 1e-05, %v243_v7  ;;  %v242_v12 = vld [vmem:[%s1420_s3] sm:$0x1]  ;;  %v495_v7 = vld [vmem:[#allocation8 + $0x58] sm:$0xff] }
  0x5c   :  { %945 = vmatpush3.bf16.msra.mxu1 %v942_v31  ;;  %v687_v15 = vld [vmem:[%s1419_s2] ss:$0 sm:$0xff] }
  0x5d   :  { %917 = vmatpush3.bf16.msra.mxu0 %v914_v23  ;;  %947 = vmatprep.subr.bf16.mxu1 %v946_v36  ;;  %1017 = vrsqrt.f32 %v244_v8  ;;  %v688_v17 = vld [vmem:[%s1422_s5] ss:$0 sm:$0xff] }
  0x5e   :  { %919 = vmatprep.subr.bf16.mxu0 %v918_v29  ;;  %v689_v25 = vld [vmem:[%s1421_s4] ss:$0 sm:$0xff] }
  0x5f   :  { %v496_v9 = vld [vmem:[#allocation8 + $0x60] sm:$0xff] }
  0x60   :  { %949 = vmatpush3.bf16.msra.mxu1 %v946_v36 }
  0x61   :  { %921 = vmatpush3.bf16.msra.mxu0 %v918_v29  ;;  %951 = vmatprep.subr.bf16.mxu1 %v950_v49 }
  0x62   :  { %923 = vmatprep.subr.bf16.mxu0 %v922_v35 }
  0x64   :  { %953 = vmatpush3.bf16.msra.mxu1 %v950_v49 }
  0x65   :  { %925 = vmatpush3.bf16.msra.mxu0 %v922_v35  ;;  %955 = vmatprep.subr.bf16.mxu1 %v954_v52 }
  0x66   :  { %927 = vmatprep.subr.bf16.mxu0 %v926_v39 }
  0x67   :  { %v1018_v11 = vpop.eup %1017 }
  0x68   :  { %957 = vmatpush3.bf16.msra.mxu1 %v954_v52  ;;  %v246_v13 = vmul.f32 %v1018_v11, %v242_v12  ;;  %v497_v11 = vld [vmem:[#allocation8 + $0x68] sm:$0xff]  ;;  %v498_v12 = vld [vmem:[#allocation8 + $0x70] sm:$0xff] }
  0x69   :  { %929 = vmatpush3.bf16.msra.mxu0 %v926_v39  ;;  %959 = vmatprep.subr.bf16.mxu1 %v958_v55 }
  0x6a   :  { %963 = vmatprep.subr.bf16.mxu0 %v1332_v59  ;;  %v266_v19 = vrot.slane %v246_v13, %v265_v14  ;;  %v499_v13 = vld [vmem:[#allocation8 + $0x78] sm:$0xff] }
  0x6c   :  { %799 = vmatmul.mubr.f32.vlgmr.msra.gmra.mrb[0].mxu0 %v107_v40  ;;  %961 = vmatpush3.bf16.msra.mxu1 %v958_v55 }
  0x6d   :  { %801 = vmatprep.mubr.f32.mxu0 %v108_v41  ;;  %994 = vmatprep.subr.bf16.mxu1 %v1332_v59 }
  0x6e   :  { %965 = vmatpush3.bf16.msra.mxu0 %v1332_v59 }
  0x6f   :  { %967 = vmatprep.subr.bf16.mxu0 %v1334_v61 }
  0x70   :  { %802 = vmatmul.mubr.f32.gmra.mrb[2].mxu0 %v109_v42 }
  0x71   :  { %804 = vmatprep.mubr.f32.mxu0 %v110_v43 }
  0x72   :  { %969 = vmatpush3.bf16.msra.mxu0 %v1334_v61 }
  0x73   :  { %971 = vmatprep.subr.bf16.mxu0 %v1340_v0 }
  0x74   :  { %805 = vmatmul.mubr.f32.gmra.mrb[4].mxu0 %v111_v44 }
  0x75   :  { %807 = vmatprep.mubr.f32.mxu0 %v112_v45 }
  0x76   :  { %973 = vmatpush3.bf16.msra.mxu0 %v1340_v0 }
  0x77   :  { %975 = vmatprep.subr.bf16.mxu0 %v1344_v3 }
  0x78   :  { %808 = vmatmul.mubr.f32.gmra.mrb[6].mxu0 %v113_v46 }
  0x7a   :  { %977 = vmatpush3.bf16.msra.mxu0 %v1344_v3 }
  0x7b   :  { %979 = vmatprep.subr.bf16.mxu0 %v1348_v6 }
  0x7e   :  { %981 = vmatpush3.bf16.msra.mxu0 %v1348_v6 }
 0x13f   :  { %v800_v16 = vpop.f32.mrb[0].mxu0 }
 0x140   :  { %v209_v18 = vadd.f32 %v800_v16, %v687_v15  ;;  %v203_v20 = vpop.f32.mrb[1].mxu0 }
 0x141   :  { %v204_v21 = vadd.f32 %v687_v15, %v203_v20 }
 0x142   :  { %v255_v22 = vsub.f32 %v209_v18, %v688_v17 }
 0x143   :  { %v254_v23 = vsub.f32 %v204_v21, %v688_v17  ;;  %v803_v24 = vpop.f32.mrb[2].mxu0  ;;  %v691_v21 = vld [vmem:[%s1428_s11] ss:$0 sm:$0xff] }
 0x144   :  { %v269_v26 = vmul.f32 %v266_v19, %v255_v22  ;;  %v219_v27 = vadd.f32 %v803_v24, %v687_v15  ;;  %v213_v28 = vpop.f32.mrb[3].mxu0 }
 0x145   :  { %v214_v29 = vadd.f32 %v687_v15, %v213_v28  ;;  %v268_v30 = vmul.f32 %v266_v19, %v254_v23 }
 0x146   :  { %v257_v31 = vsub.f32 %v219_v27, %v688_v17  ;;  %v284_v32 = vadd.f32 %v689_v25, %v269_v26  ;;  %v692_v27 = vld [vmem:[%s1427_s10] ss:$0 sm:$0xff]  ;;  %s1177_s10 = smov [#allocation10]  }
 0x147   :  { %v256_v33 = vsub.f32 %v214_v29, %v688_v17  ;;  %v806_v34 = vpop.f32.mrb[4].mxu0  ;;  %v283_v35 = vadd.f32 %v689_v25, %v268_v30  ;;  %s673_s11 = sshll.u32 %s1177_s10, 4  ;;  %s674_s11 = int_to_ptr.vmem [resolvable:$true] %s673_s11 }
 0x148   :  { %v271_v36 = vmul.f32 %v266_v19, %v257_v31  ;;  %v229_v37 = vadd.f32 %v806_v34, %v687_v15  ;;  %v223_v38 = vpop.f32.mrb[5].mxu0  ;;  %v292_v43 = vmax.f32 %v284_v32, 0.0  ;;  %p1146_p5 = scmp.lt.s32.totalorder %s674_s11, %s674_s11 }
 0x149   :  { %v270_v39 = vmul.f32 %v266_v19, %v256_v33  ;;  %v224_v40 = vadd.f32 %v687_v15, %v223_v38  ;;  %v291_v41 = vmax.f32 %v283_v35, 0.0 }
 0x14a   :  { %v259_v42 = vsub.f32 %v229_v37, %v688_v17  ;;  %v286_v44 = vadd.f32 %v689_v25, %v271_v36 }
 0x14b   :  { %v258_v45 = vsub.f32 %v224_v40, %v688_v17  ;;  %v809_v46 = vpop.f32.mrb[6].mxu0  ;;  %842 = vmatprep.mubr.f32.mxu1 %v291_v41  ;;  %v285_v47 = vadd.f32 %v689_v25, %v270_v39 }
 0x14c   :  { %v273_v48 = vmul.f32 %v266_v19, %v259_v42  ;;  %v239_v49 = vadd.f32 %v809_v46, %v687_v15  ;;  %v233_v50 = vpop.f32.mrb[7].mxu0  ;;  %843 = vmatmul.mubr.f32.vlgmr.msra.gmra.mrb[0].mxu1 %v292_v43  ;;  %v294_v55 = vmax.f32 %v286_v44, 0.0 }
 0x14d   :  { %v272_v51 = vmul.f32 %v266_v19, %v258_v45  ;;  %v234_v52 = vadd.f32 %v687_v15, %v233_v50  ;;  %v293_v53 = vmax.f32 %v285_v47, 0.0  ;;  %1002 = vmatpush3.bf16.msra.mxu1 %v1332_v59 }
 0x14e   :  { %v261_v54 = vsub.f32 %v239_v49, %v688_v17  ;;  %v288_v56 = vadd.f32 %v689_v25, %v273_v48  ;;  %995 = vmatprep.subr.bf16.mxu1 %v1334_v61 }
 0x14f   :  { %v260_v57 = vsub.f32 %v234_v52, %v688_v17  ;;  %845 = vmatprep.mubr.f32.mxu1 %v293_v53  ;;  %v287_v58 = vadd.f32 %v689_v25, %v272_v51  ;;  %v427_v17 = vld [vmem:[%s1426_s9] sm:$0x1] }
 0x150   :  { %v275_v60 = vmul.f32 %v266_v19, %v261_v54  ;;  %846 = vmatmul.mubr.f32.gmra.mrb[2].mxu1 %v294_v55  ;;  %v296_v1 = vmax.f32 %v288_v56, 0.0 }
 0x151   :  { %v274_v62 = vmul.f32 %v266_v19, %v260_v57  ;;  %v295_v63 = vmax.f32 %v287_v58, 0.0  ;;  %1003 = vmatpush3.bf16.msra.mxu1 %v1334_v61  ;;  %v494_v61 = vld [vmem:[#allocation8 + $0x50] sm:$0xff]  ;;  %v690_v19 = vld [vmem:[%s1425_s8] ss:$0 sm:$0xff] }
 0x152   :  { %v290_v2 = vadd.f32 %v689_v25, %v275_v60  ;;  %996 = vmatprep.subr.bf16.mxu1 %v1340_v0  ;;  %v982_v8 = vpack.c.bf16 %v495_v7, %v494_v61 }
 0x153   :  { %848 = vmatprep.mubr.f32.mxu1 %v295_v63  ;;  %v289_v59 = vadd.f32 %v689_v25, %v274_v62 }
 0x154   :  { %849 = vmatmul.mubr.f32.gmra.mrb[4].mxu1 %v296_v1  ;;  %v298_v5 = vmax.f32 %v290_v2, 0.0  ;;  %983 = vmatprep.subr.bf16.mxu0 %v982_v8 }
 0x155   :  { %v297_v4 = vmax.f32 %v289_v59, 0.0  ;;  %1004 = vmatpush3.bf16.msra.mxu1 %v1340_v0  ;;  %985 = vmatpush3.bf16.msra.mxu0 %v982_v8  ;;  %v986_v0 = vpack.c.bf16 %v497_v11, %v496_v9 }
 0x156   :  { %997 = vmatprep.subr.bf16.mxu1 %v1344_v3 }
 0x157   :  { %851 = vmatprep.mubr.f32.mxu1 %v297_v4  ;;  %987 = vmatprep.subr.bf16.mxu0 %v986_v0 }
 0x158   :  { %852 = vmatmul.mubr.f32.gmra.mrb[6].mxu1 %v298_v5 }
 0x159   :  { %1005 = vmatpush3.bf16.msra.mxu1 %v1344_v3  ;;  %989 = vmatpush3.bf16.msra.mxu0 %v986_v0  ;;  %v990_v3 = vpack.c.bf16 %v499_v13, %v498_v12 }
 0x15a   :  { %998 = vmatprep.subr.bf16.mxu1 %v1348_v6 }
 0x15b   :  { %991 = vmatprep.subr.bf16.mxu0 %v990_v3 }
 0x15d   :  { %1006 = vmatpush3.bf16.msra.mxu1 %v1348_v6  ;;  %993 = vmatpush3.bf16.msra.mxu0 %v990_v3  ;;  %v428_v6 = vld [vmem:[%s1429_s12] sm:$0x1] }
 0x15e   :  { %999 = vmatprep.subr.bf16.mxu1 %v982_v8  ;;  %v429_v15 = vadd.f32 1e-05, %v428_v6 }
 0x160   :  { %1019 = vrsqrt.f32 %v429_v15 }
 0x161   :  { %1007 = vmatpush3.bf16.msra.mxu1 %v982_v8  ;;  %v693_v8 = vld [vmem:[%s1431_s14] ss:$0 sm:$0xff]  ;;  %s1141_s14 = scalar_lea.vmem %s674_s11, 1024 }
 0x162   :  { %1000 = vmatprep.subr.bf16.mxu1 %v986_v0  ;;  %p1142_p4 = scmp.ne.s32.totalorder %s674_s11, %s1141_s14  ;;  %p1147_p6 = scmp.lt.s32.totalorder %s1141_s14, %s1141_s14 }
 0x164   :  { %p1148_p7 = por %p1147_p6, %p1146_p5 }
 0x165   :  { %1008 = vmatpush3.bf16.msra.mxu1 %v986_v0 }
 0x166   :  { %1001 = vmatprep.subr.bf16.mxu1 %v990_v3  ;;  %p1149_p8 = pnand %p1148_p7, %p1142_p4 }
 0x169   :  { %1009 = vmatpush3.bf16.msra.mxu1 %v990_v3 }
 0x16a   :  { %v1020_v16 = vpop.eup %1019 }
 0x16b   :  { %v431_v18 = vmul.f32 %v1020_v16, %v427_v17 }
 0x16d   :  { %v451_v23 = vrot.slane %v431_v18, %v265_v14 }
 0x21f   :  { %v844_v20 = vpop.f32.mrb[0].mxu1 }
 0x220   :  { %v394_v22 = vadd.f32 %v844_v20, %v690_v19  ;;  %v388_v24 = vpop.f32.mrb[1].mxu1 }
 0x221   :  { %v389_v25 = vadd.f32 %v690_v19, %v388_v24 }
 0x222   :  { %v440_v26 = vsub.f32 %v394_v22, %v691_v21 }
 0x223   :  { %v439_v28 = vsub.f32 %v389_v25, %v691_v21  ;;  %v847_v29 = vpop.f32.mrb[2].mxu1 }
 0x224   :  { %v454_v30 = vmul.f32 %v451_v23, %v440_v26  ;;  %v404_v31 = vadd.f32 %v847_v29, %v690_v19  ;;  %v398_v32 = vpop.f32.mrb[3].mxu1 }
 0x225   :  { %v453_v33 = vmul.f32 %v451_v23, %v439_v28  ;;  %v399_v34 = vadd.f32 %v690_v19, %v398_v32 }
 0x226   :  { %v469_v35 = vadd.f32 %v692_v27, %v454_v30  ;;  %v442_v36 = vsub.f32 %v404_v31, %v691_v21 }
 0x227   :  { %v441_v37 = vsub.f32 %v399_v34, %v691_v21  ;;  %v850_v38 = vpop.f32.mrb[4].mxu1  ;;  %v468_v10 = vadd.f32 %v692_v27, %v453_v33 }
 0x228   :  { %v456_v14 = vmul.f32 %v451_v23, %v442_v36  ;;  %v414_v39 = vadd.f32 %v850_v38, %v690_v19  ;;  %v408_v40 = vpop.f32.mrb[5].mxu1  ;;  %v477_v44 = vmax.f32 %v469_v35, 0.0 }
 0x229   :  { %v455_v41 = vmul.f32 %v451_v23, %v441_v37  ;;  %v409_v42 = vadd.f32 %v690_v19, %v408_v40  ;;  %v476_v43 = vmax.f32 %v468_v10, 0.0 }
 0x22a   :  { %v444_v45 = vsub.f32 %v414_v39, %v691_v21  ;;  %v471_v46 = vadd.f32 %v692_v27, %v456_v14 }
 0x22b   :  { %v443_v47 = vsub.f32 %v409_v42, %v691_v21  ;;  %v853_v48 = vpop.f32.mrb[6].mxu1  ;;  %886 = vmatprep.mubr.f32.mxu0 %v476_v43  ;;  %v470_v49 = vadd.f32 %v692_v27, %v455_v41 }
 0x22c   :  { %v458_v50 = vmul.f32 %v451_v23, %v444_v45  ;;  %v424_v51 = vadd.f32 %v853_v48, %v690_v19  ;;  %v418_v52 = vpop.f32.mrb[7].mxu1  ;;  %887 = vmatmul.mubr.f32.vlgmr.msra.gmra.mrb[8].mxu0 %v477_v44  ;;  %v479_v58 = vmax.f32 %v471_v46, 0.0 }
 0x22d   :  { %v457_v53 = vmul.f32 %v451_v23, %v443_v47  ;;  %v419_v54 = vadd.f32 %v690_v19, %v418_v52  ;;  %v478_v55 = vmax.f32 %v470_v49, 0.0 }
 0x22e   :  { %v473_v56 = vadd.f32 %v692_v27, %v458_v50  ;;  %v446_v57 = vsub.f32 %v424_v51, %v691_v21 }
 0x22f   :  { %v445_v60 = vsub.f32 %v419_v54, %v691_v21  ;;  %889 = vmatprep.mubr.f32.mxu0 %v478_v55  ;;  %v472_v62 = vadd.f32 %v692_v27, %v457_v53 }
 0x230   :  { %v460_v63 = vmul.f32 %v451_v23, %v446_v57  ;;  %890 = vmatmul.mubr.f32.gmra.mrb[10].mxu0 %v479_v58  ;;  %v481_v59 = vmax.f32 %v473_v56, 0.0 }
 0x231   :  { %v459_v1 = vmul.f32 %v451_v23, %v445_v60  ;;  %v480_v2 = vmax.f32 %v472_v62, 0.0 }
 0x232   :  { %v475_v4 = vadd.f32 %v692_v27, %v460_v63 }
 0x233   :  { %892 = vmatprep.mubr.f32.mxu1 %v480_v2  ;;  %v474_v5 = vadd.f32 %v692_v27, %v459_v1 }
 0x234   :  { %893 = vmatmul.mubr.f32.vlgmr.msra.gmra.mrb[8].mxu1 %v481_v59  ;;  %v483_v7 = vmax.f32 %v475_v4, 0.0 }
 0x235   :  { %v482_v61 = vmax.f32 %v474_v5, 0.0 }
 0x237   :  { %895 = vmatprep.mubr.f32.mxu1 %v482_v61 }
 0x238   :  { %896 = vmatmul.mubr.f32.gmra.mrb[10].mxu1 %v483_v7 }
 0x2ff   :  { %v888_v9 = vpop.f32.mrb[8].mxu0 }
 0x300   :  { %v579_v11 = vadd.f32 %v888_v9, %v693_v8  ;;  %v573_v0 = vpop.f32.mrb[9].mxu0 }
 0x301   :  { %v574_v12 = vadd.f32 %v693_v8, %v573_v0 }
 0x302   :  { %v613_v13 = vsub.f32 0.0, %v579_v11 }
 0x303   :  { %v612_v3 = vsub.f32 0.0, %v574_v12  ;;  %v891_v6 = vpop.f32.mrb[10].mxu0 }
 0x304   :  { %v622_v15 = vmul.f32 1.442695, %v613_v13  ;;  %v589_v16 = vadd.f32 %v891_v6, %v693_v8  ;;  %v583_v17 = vpop.f32.mrb[11].mxu0 }
 0x305   :  { %v620_v18 = vmul.f32 1.442695, %v612_v3  ;;  %v584_v19 = vadd.f32 %v693_v8, %v583_v17 }
 0x306   :  { %1021 = vpow2.f32 %v622_v15  ;;  %v615_v20 = vsub.f32 0.0, %v589_v16 }
 0x307   :  { %1023 = vpow2.f32 %v620_v18  ;;  %v614_v21 = vsub.f32 0.0, %v584_v19  ;;  %v894_v22 = vpop.f32.mrb[8].mxu1 }
 0x308   :  { %v626_v23 = vmul.f32 1.442695, %v615_v20  ;;  %v599_v24 = vadd.f32 %v894_v22, %v693_v8  ;;  %v593_v25 = vpop.f32.mrb[9].mxu1 }
 0x309   :  { %v624_v26 = vmul.f32 1.442695, %v614_v21  ;;  %v594_v27 = vadd.f32 %v693_v8, %v593_v25 }
 0x30a   :  { %1025 = vpow2.f32 %v626_v23  ;;  %v617_v28 = vsub.f32 0.0, %v599_v24 }
 0x30b   :  { %1027 = vpow2.f32 %v624_v26  ;;  %v616_v29 = vsub.f32 0.0, %v594_v27  ;;  %v897_v30 = vpop.f32.mrb[10].mxu1 }
 0x30c   :  { %v630_v31 = vmul.f32 1.442695, %v617_v28  ;;  %v609_v32 = vadd.f32 %v897_v30, %v693_v8  ;;  %v603_v33 = vpop.f32.mrb[11].mxu1 }
 0x30d   :  { %v628_v34 = vmul.f32 1.442695, %v616_v29  ;;  %v604_v35 = vadd.f32 %v693_v8, %v603_v33 }
 0x30e   :  { %1029 = vpow2.f32 %v630_v31  ;;  %v619_v36 = vsub.f32 0.0, %v609_v32 }
 0x30f   :  { %1031 = vpow2.f32 %v628_v34  ;;  %v618_v37 = vsub.f32 0.0, %v604_v35 }
 0x310   :  { %v1022_v38 = vpop.eup %1021  ;;  %v634_v10 = vmul.f32 1.442695, %v619_v36 }
 0x311   :  { %v1024_v14 = vpop.eup %1023  ;;  %v637_v39 = vadd.f32 1.0, %v1022_v38  ;;  %v632_v40 = vmul.f32 1.442695, %v618_v37 }
 0x312   :  { %v636_v41 = vadd.f32 1.0, %v1024_v14  ;;  %1033 = vpow2.f32 %v634_v10 }
 0x313   :  { %1035 = vrcp.f32 %v637_v39 }
 0x314   :  { %v1026_v42 = vpop.eup %1025  ;;  %1037 = vrcp.f32 %v636_v41 }
 0x315   :  { %v1028_v43 = vpop.eup %1027  ;;  %v639_v44 = vadd.f32 1.0, %v1026_v42  ;;  %1039 = vpow2.f32 %v632_v40 }
 0x316   :  { %v638_v45 = vadd.f32 1.0, %v1028_v43 }
 0x317   :  { %1041 = vrcp.f32 %v639_v44 }
 0x318   :  { %v1030_v46 = vpop.eup %1029  ;;  %1043 = vrcp.f32 %v638_v45 }
 0x319   :  { %v1032_v47 = vpop.eup %1031  ;;  %v641_v48 = vadd.f32 1.0, %v1030_v46 }
 0x31a   :  { %v640_v49 = vadd.f32 1.0, %v1032_v47 }
 0x31b   :  { %1045 = vrcp.f32 %v641_v48 }
 0x31c   :  { %v1034_v50 = vpop.eup %1033  ;;  %1047 = vrcp.f32 %v640_v49 }
 0x31d   :  { %v1036_v51 = vpop.eup %1035  ;;  %v643_v52 = vadd.f32 1.0, %v1034_v50 }
 0x31e   :  { %v1038_v53 = vpop.eup %1037  ;;  %661 = vst [vmem:[#allocation10 + $0x8] sm:$0xff] %v1036_v51 }
 0x31f   :  { %v1040_v54 = vpop.eup %1039  ;;  %660 = vst [vmem:[#allocation10] sm:$0xff] %v1038_v53  ;;  %1049 = vrcp.f32 %v643_v52 }
 0x320   :  { %v642_v55 = vadd.f32 1.0, %v1040_v54 }
 0x321   :  { %v1042_v56 = vpop.eup %1041 }
 0x322   :  { %v1044_v57 = vpop.eup %1043  ;;  %663 = vst [vmem:[#allocation10 + $0x18] sm:$0xff] %v1042_v56  ;;  %1051 = vrcp.f32 %v642_v55 }
 0x323   :  { %662 = vst [vmem:[#allocation10 + $0x10] sm:$0xff] %v1044_v57 }
 0x325   :  { %v1046_v58 = vpop.eup %1045 }
 0x326   :  { %v1048_v60 = vpop.eup %1047  ;;  %665 = vst [vmem:[#allocation10 + $0x28] sm:$0xff] %v1046_v58 }
 0x327   :  { %664 = vst [vmem:[#allocation10 + $0x20] sm:$0xff] %v1048_v60 }
 0x329   :  { %v1050_v62 = vpop.eup %1049 }
 0x32a   :  { %667 = vst [vmem:[#allocation10 + $0x38] sm:$0xff] %v1050_v62 }
 0x32c   :  { %v1052_v63 = vpop.eup %1051 }
 0x32d   :  { %666 = vst [vmem:[#allocation10 + $0x30] sm:$0xff] %v1052_v63 }
 0x32e   :  { %1152 = shalt.err (!%p1149_p8)
}
 0x32f   :  { %s1153_s17 = scalar_lea.hbm %s1432_s15, 1024 }
 0x330   :  { %p1154_p9 = scmp.ne.s32.totalorder %s1432_s15, %s1153_s17  ;;  %p1157_p10 = scmp.lt.u32.totalorder %s1153_s17, %s1432_s15 }
 0x332   :  { %p1159_p11 = pnand %p1157_p10, %p1154_p9 }
 0x334   :  { %1162 = shalt.err (!%p1159_p11)
}
 0x335   :  { %679 = dma.vmem_to_hbm [thread:$0]  %s674_s11, 1024, %s1432_s15, [#allocation4], %s1173_s30, %s1173_s30, %s1174_s16  }
 0x336   :  { %1169 = dma.done.wait [#allocation4], 1024  }
 0x337   :  { %1170 = vsyncadd [#allocation4], 4294966272 }
 0x338   :  { %683 = vsyncpa [#allocation3], 1 }
 0x339   :  { %684 = vsyncpa [#allocation6], 1 }
 0x33a   :  { %685 = vsyncpa [#allocation9], 1 }
 0x33b   :  { %686 = vsyncpa [#allocation4], 1 }

</bundles_post_ra>
